<compile_context>
chip_gen: v5e
topology: v5e:2x2
jax: 0.10.0
libtpu: 0.0.40
codegen_flags: <defaults>
</compile_context>

<pallas_src>
import jax
import jax.numpy as jnp
from jax.experimental import pallas as pl
from jax.experimental.pallas import tpu as pltpu


def _round_up(x, m):
    return (x + m - 1) // m * m


def _vae_labels_kernel(x_ref, w1_ref, b1_ref, w2_ref, b2_ref, eps_ref, out_ref):
    two_z = b2_ref.shape[-1]
    zdim = two_z // 2

    # fc1 + ReLU: bf16 operands on the MXU, f32 accumulate + f32 tail.
    h = jnp.dot(x_ref[...], w1_ref[...], preferred_element_type=jnp.float32)
    h = jnp.maximum(h + b1_ref[...], 0.0)

    # Fused fc21|fc22 -> ml = [mu | log_var] in a single MXU pass.
    ml = jnp.dot(h.astype(jnp.bfloat16), w2_ref[...],
                 preferred_element_type=jnp.float32) + b2_ref[...]

    # Reparameterization: z = mu + eps * exp(0.5 * log_var)   (all f32 tail).
    mu = ml[:, :zdim]
    log_var = ml[:, zdim:]
    z = mu + eps_ref[...] * jnp.exp(0.5 * log_var)

    # Single packed, lane-contiguous store: [mu | log_var | z].
    # mu/log_var are already adjacent inside ml -> concat only [ml, z].
    out_ref[...] = jnp.concatenate([ml, z], axis=-1).astype(out_ref.dtype)


def prepare_params(params):
    """One-time parameter prep (hoisted out of the per-call wrapper):
    fuse fc21/fc22 into one projection and cast weights to bf16 for the MXU."""
    w2 = jnp.concatenate([params["w21"], params["w22"]], axis=1)   # (h, 2z)
    b2 = jnp.concatenate([params["b21"], params["b22"]], axis=1)   # (1, 2z)
    return {
        "w1": params["w1"].astype(jnp.bfloat16),
        "b1": params["b1"].astype(jnp.float32),
        "w2": w2.astype(jnp.bfloat16),
        "b2": b2.astype(jnp.float32),
    }


def vae_color_labels_forward(x_labels, prepared, *, key=None, eps=None,
                             block_b=512):
    """Fused VAEcolorlabels forward.  Returns (z, mu, log_var).

    x_labels: (B, xlabel_dim) float
    prepared: output of prepare_params()
    key:      jax PRNG key used to draw eps if `eps` is not given
    eps:      optional (B, zlabel_dim) standard-normal noise
    """
    B, xdim = x_labels.shape
    hdim = prepared["w1"].shape[1]
    zdim = prepared["w2"].shape[1] // 2

    # Batch tile: big tiles (fewer grid steps), rounded to 16 for bf16 x.
    tb = min(block_b, _round_up(B, 16))
    tb = _round_up(tb, 16)
    # Keep >=2 grid steps when the batch is big enough (v7x: 2 TensorCores).
    if _round_up(B, tb) // tb < 2 and B >= 32:
        tb = _round_up((B + 1) // 2, 16)
    b_pad = _round_up(B, tb)

    # bf16 activations: halves the dominant HBM->VMEM stream; numerically
    # identical since x went through bf16 before the MXU anyway.
    x_bf16 = x_labels.astype(jnp.bfloat16)
    if b_pad != B:
        x_bf16 = jnp.pad(x_bf16, ((0, b_pad - B), (0, 0)))

    if eps is None:
        if key is None:
            key = jax.random.PRNGKey(0)
        eps = jax.random.normal(key, (B, zdim), jnp.float32)
    eps = eps.astype(jnp.float32)
    if b_pad != B:
        eps = jnp.pad(eps, ((0, b_pad - B), (0, 0)))

    out = pl.pallas_call(
        _vae_labels_kernel,
        out_shape=jax.ShapeDtypeStruct((b_pad, 3 * zdim), jnp.float32),
        grid=(b_pad // tb,),
        in_specs=[
            # batch-tiled activations (bf16)
            pl.BlockSpec((tb, xdim), lambda i: (i, 0)),
            # weights / biases: same block every step -> stay VMEM-resident
            pl.BlockSpec((xdim, hdim), lambda i: (0, 0)),
            pl.BlockSpec((1, hdim), lambda i: (0, 0)),
            pl.BlockSpec((hdim, 2 * zdim), lambda i: (0, 0)),
            pl.BlockSpec((1, 2 * zdim), lambda i: (0, 0)),
            # batch-tiled reparameterization noise
            pl.BlockSpec((tb, zdim), lambda i: (i, 0)),
        ],
        out_specs=pl.BlockSpec((tb, 3 * zdim), lambda i: (i, 0)),
        compiler_params=pltpu.CompilerParams(
            dimension_semantics=("parallel",)),
    )(x_bf16, prepared["w1"], prepared["b1"], prepared["w2"], prepared["b2"],
      eps)

    mu = out[:B, :zdim]
    log_var = out[:B, zdim:2 * zdim]
    z = out[:B, 2 * zdim:]
    return z, mu, log_var


def init_params(key, xlabel_dim, hlabel_dim, zlabel_dim):
    """Deterministic synthetic init (PyTorch-Linear-style uniform bounds)."""
    ks = jax.random.split(key, 6)

    def lin(kw, kb, fan_in, fan_out):
        bound = 1.0 / jnp.sqrt(fan_in)
        w = jax.random.uniform(kw, (fan_in, fan_out), jnp.float32, -bound, bound)
        b = jax.random.uniform(kb, (1, fan_out), jnp.float32, -bound, bound)
        return w, b

    w1, b1 = lin(ks[0], ks[1], xlabel_dim, hlabel_dim)
    w21, b21 = lin(ks[2], ks[3], hlabel_dim, zlabel_dim)
    w22, b22 = lin(ks[4], ks[5], hlabel_dim, zlabel_dim)
    return {"w1": w1, "b1": b1, "w21": w21, "b21": b21, "w22": w22, "b22": b22}


if __name__ == "__main__":
    key = jax.random.PRNGKey(0)
    k_x, k_p, k_eps = jax.random.split(key, 3)

    batch, xlabel_dim, hlabel_dim, zlabel_dim = 8, 16, 32, 8

    x_labels = jax.random.normal(k_x, (batch, xlabel_dim), jnp.float32)
    params = init_params(k_p, xlabel_dim, hlabel_dim, zlabel_dim)
    prepared = prepare_params(params)

    # Explicit eps so the stochastic part can be checked exactly.
    eps = jax.random.normal(k_eps, (batch, zlabel_dim), jnp.float32)

    z, mu, log_var = vae_color_labels_forward(x_labels, prepared, eps=eps)
    jax.block_until_ready(z)

    # Pure-JAX reference using the same bf16 MXU operand path.
    w1b = prepared["w1"]
    w2b = prepared["w2"]
    b2r = prepared["b2"]
    h_ref = jnp.maximum(
        jnp.dot(x_labels.astype(jnp.bfloat16), w1b,
                preferred_element_type=jnp.float32) + params["b1"], 0.0)
    ml_ref = jnp.dot(h_ref.astype(jnp.bfloat16), w2b,
                     preferred_element_type=jnp.float32) + b2r
    mu_ref = ml_ref[:, :zlabel_dim]
    lv_ref = ml_ref[:, zlabel_dim:]
    z_ref = mu_ref + eps * jnp.exp(0.5 * lv_ref)

    assert jnp.allclose(mu, mu_ref, atol=2e-3, rtol=2e-3)
    assert jnp.allclose(log_var, lv_ref, atol=2e-3, rtol=2e-3)
    assert jnp.allclose(z, z_ref, atol=2e-3, rtol=2e-3)
    assert bool(jnp.all(jnp.isfinite(z)))

    print("KERNEL_OK")
</pallas_src>

<mosaic_0001>
module attributes {stable_mosaic.version = 11 : i64} {
  func.func @_vae_labels_kernel(%arg0: i32, %arg1: memref<16x16xbf16, #tpu.memory_space<vmem>>, %arg2: memref<16x32xbf16, #tpu.memory_space<vmem>>, %arg3: memref<1x32xf32, #tpu.memory_space<vmem>>, %arg4: memref<32x16xbf16, #tpu.memory_space<vmem>>, %arg5: memref<1x16xf32, #tpu.memory_space<vmem>>, %arg6: memref<16x8xf32, #tpu.memory_space<vmem>>, %arg7: memref<16x24xf32, #tpu.memory_space<vmem>>) attributes {dimension_semantics = [#tpu.dimension_semantics<parallel>], iteration_bounds = array<i64: 1>, scalar_prefetch = 0 : i64, scratch_operands = 0 : i64, tpu.core_type = #tpu.core_type<tc>, window_params = [{transform_indices = @transform_0, window_bounds = array<i64: 16, 16>}, {pipeline_mode = #tpu.pipeline_mode<synchronous>, transform_indices = @transform_1, window_bounds = array<i64: 16, 32>}, {pipeline_mode = #tpu.pipeline_mode<synchronous>, transform_indices = @transform_2, window_bounds = array<i64: 1, 32>}, {pipeline_mode = #tpu.pipeline_mode<synchronous>, transform_indices = @transform_3, window_bounds = array<i64: 32, 16>}, {pipeline_mode = #tpu.pipeline_mode<synchronous>, transform_indices = @transform_4, window_bounds = array<i64: 1, 16>}, {transform_indices = @transform_5, window_bounds = array<i64: 16, 8>}, {transform_indices = @transform_6, window_bounds = array<i64: 16, 24>}]} {
    %c0 = arith.constant 0 : index
    %c0_0 = arith.constant 0 : index
    %0 = vector.load %arg1[%c0, %c0_0] : memref<16x16xbf16, #tpu.memory_space<vmem>>, vector<16x16xbf16>
    %c0_1 = arith.constant 0 : index
    %c0_2 = arith.constant 0 : index
    %1 = vector.load %arg2[%c0_1, %c0_2] : memref<16x32xbf16, #tpu.memory_space<vmem>>, vector<16x32xbf16>
    %cst = arith.constant dense<0.000000e+00> : vector<16x32xf32>
    %2 = tpu.matmul %0, %1, %cst {dimension_numbers = #tpu.dot_dimension_numbers<[1], [0], [0], [1], [0, 0, 1, 1], [], []>} : vector<16x16xbf16>, vector<16x32xbf16>, vector<16x32xf32> -> vector<16x32xf32>
    %c0_3 = arith.constant 0 : index
    %c0_4 = arith.constant 0 : index
    %3 = vector.load %arg3[%c0_3, %c0_4] : memref<1x32xf32, #tpu.memory_space<vmem>>, vector<1x32xf32>
    %4 = vector.broadcast %3 : vector<1x32xf32> to vector<16x32xf32>
    %5 = arith.addf %2, %4 : vector<16x32xf32>
    %cst_5 = arith.constant 0.000000e+00 : f32
    %6 = vector.broadcast %cst_5 : f32 to vector<16x32xf32>
    %7 = arith.maximumf %5, %6 : vector<16x32xf32>
    %8 = arith.truncf %7 : vector<16x32xf32> to vector<16x32xbf16>
    %c0_6 = arith.constant 0 : index
    %c0_7 = arith.constant 0 : index
    %9 = vector.load %arg4[%c0_6, %c0_7] : memref<32x16xbf16, #tpu.memory_space<vmem>>, vector<32x16xbf16>
    %cst_8 = arith.constant dense<0.000000e+00> : vector<16x16xf32>
    %10 = tpu.matmul %8, %9, %cst_8 {dimension_numbers = #tpu.dot_dimension_numbers<[1], [0], [0], [1], [0, 0, 1, 1], [], []>} : vector<16x32xbf16>, vector<32x16xbf16>, vector<16x16xf32> -> vector<16x16xf32>
    %c0_9 = arith.constant 0 : index
    %c0_10 = arith.constant 0 : index
    %11 = vector.load %arg5[%c0_9, %c0_10] : memref<1x16xf32, #tpu.memory_space<vmem>>, vector<1x16xf32>
    %12 = vector.broadcast %11 : vector<1x16xf32> to vector<16x16xf32>
    %13 = arith.addf %10, %12 : vector<16x16xf32>
    %14 = vector.extract_strided_slice %13 {offsets = [0, 0], sizes = [16, 8], strides = [1, 1]} : vector<16x16xf32> to vector<16x8xf32>
    %15 = vector.extract_strided_slice %13 {offsets = [0, 8], sizes = [16, 8], strides = [1, 1]} : vector<16x16xf32> to vector<16x8xf32>
    %c0_11 = arith.constant 0 : index
    %c0_12 = arith.constant 0 : index
    %16 = vector.load %arg6[%c0_11, %c0_12] : memref<16x8xf32, #tpu.memory_space<vmem>>, vector<16x8xf32>
    %cst_13 = arith.constant 5.000000e-01 : f32
    %17 = vector.broadcast %cst_13 : f32 to vector<16x8xf32>
    %18 = arith.mulf %17, %15 : vector<16x8xf32>
    %19 = math.exp %18 : vector<16x8xf32>
    %20 = arith.mulf %16, %19 : vector<16x8xf32>
    %21 = arith.addf %14, %20 : vector<16x8xf32>
    %22 = tpu.concatenate %13, %21 in 1 : vector<16x16xf32>, vector<16x8xf32> -> vector<16x24xf32>
    %c0_14 = arith.constant 0 : index
    %c0_15 = arith.constant 0 : index
    %23 = vector.load %arg7[%c0_14, %c0_15] : memref<16x24xf32, #tpu.memory_space<vmem>>, vector<16x24xf32>
    tpu.vector_store %arg7[%c0_14, %c0_15], %22 {strides = array<i32>} : memref<16x24xf32, #tpu.memory_space<vmem>>, vector<16x24xf32>,
    return
  }
  func.func @transform_0(%arg0: i32) -> (i32, i32) {
    %c0_i32 = arith.constant 0 : i32
    %c0_i32_0 = arith.constant 0 : i32
    return %arg0, %c0_i32 : i32, i32
  }
  func.func @transform_1(%arg0: i32) -> (i32, i32) {
    %c0_i32 = arith.constant 0 : i32
    %c0_i32_0 = arith.constant 0 : i32
    %c0_i32_1 = arith.constant 0 : i32
    return %c0_i32, %c0_i32_0 : i32, i32
  }
  func.func @transform_2(%arg0: i32) -> (i32, i32) {
    %c0_i32 = arith.constant 0 : i32
    %c0_i32_0 = arith.constant 0 : i32
    %c0_i32_1 = arith.constant 0 : i32
    return %c0_i32, %c0_i32_0 : i32, i32
  }
  func.func @transform_3(%arg0: i32) -> (i32, i32) {
    %c0_i32 = arith.constant 0 : i32
    %c0_i32_0 = arith.constant 0 : i32
    %c0_i32_1 = arith.constant 0 : i32
    return %c0_i32, %c0_i32_0 : i32, i32
  }
  func.func @transform_4(%arg0: i32) -> (i32, i32) {
    %c0_i32 = arith.constant 0 : i32
    %c0_i32_0 = arith.constant 0 : i32
    %c0_i32_1 = arith.constant 0 : i32
    return %c0_i32, %c0_i32_0 : i32, i32
  }
  func.func @transform_5(%arg0: i32) -> (i32, i32) {
    %c0_i32 = arith.constant 0 : i32
    %c0_i32_0 = arith.constant 0 : i32
    return %arg0, %c0_i32 : i32, i32
  }
  func.func @transform_6(%arg0: i32) -> (i32, i32) {
    %c0_i32 = arith.constant 0 : i32
    %c0_i32_0 = arith.constant 0 : i32
    return %arg0, %c0_i32 : i32, i32
  }
}

</mosaic_0001>

<bundles_post_ra>
// kernel: tpu_custom_call.1
= control target key start
LH: loop header
LB: loop body
LE: loop exit
PB: predicated region body
PF: predicated region fallthrough
CT: control target
= control target key end

     0   :  { %s283_s0 = inlined_call_operand.vmem [shape: bf16[16,16], index: 0, kind: input, shape index: {}]   ;;  %s284_s1 = inlined_call_operand.vmem [shape: bf16[16,32], index: 1, kind: input, shape index: {}]   ;;  %s285_s2 = inlined_call_operand.vmem [shape: f32[1,32], index: 2, kind: input, shape index: {}]   ;;  %s286_s3 = inlined_call_operand.vmem [shape: bf16[32,16], index: 3, kind: input, shape index: {}]   ;;  %s287_s4 = inlined_call_operand.vmem [shape: f32[1,16], index: 4, kind: input, shape index: {}]   ;;  %s288_s5 = inlined_call_operand.vmem [shape: f32[16,8], index: 5, kind: input, shape index: {}]   ;;  %s289_s6 = inlined_call_operand.hbm [shape: f32[16,24], index: 6, kind: output, shape index: {}]  }
   0x1   :  { %v173_v0 = vld [vmem:[%s284_s1] sm:$0xff] }
   0x2   :  { %v172_v1 = vld [vmem:[%s283_s0] sm:$0xff] }
   0x3   :  { %11 = vsyncpa [#allocation3], 0  ;;  %55 = vmatpush.bf16.msra.mxu0 %v173_v0  ;;  %vm44_vm0 = vcmask 130048   ;;  %v175_v2 = vld [vmem:[%s286_s3 + $0x8] sm:$0xff]  ;;  %v174_v3 = vld [vmem:[%s286_s3] sm:$0xff]  ;;  %vm85_vm1 = vcmask 261120  }
   0x4   :  { %95 = vmatpush.bf16.msra.mxu1 %v175_v2  ;;  %v181_v5 = vld [vmem:[%s285_s2] ss:$0 sm:$0xff]  ;;  %s213_s2 = smov 120   ;;  %v104_v27 = vld [vmem:[%s288_s5 + $0x8] sm:$0xff]  ;;  %vm133_vm2 = vcmask 195584   ;;  %s215_s10 = smov [#allocation2]  }
   0x5   :  { %v182_v12 = vld [vmem:[%s287_s4] ss:$0 sm:$0xff]  ;;  %s214_s4 = smov 16   ;;  %s140_s11 = sshll.u32 %s215_s10, 4  ;;  %s141_s11 = int_to_ptr.vmem [resolvable:$true] %s140_s11 }
   0x6   :  { %162 = vmatmul.msk.bf16.vlgmr.msra.gmra.mxu0 %vm44_vm0, %v172_v1  ;;  %v103_v23 = vld [vmem:[%s288_s5] sm:$0xff]  ;;  %s142_s14 = sshll.u32 %s289_s6, 4  ;;  %s216_s5 = smov 128   ;;  %s143_s14 = int_to_ptr.hbm [resolvable:$true] %s142_s14 }
   0x7   :  { %s217_s15 = smov 8  }
   0x8   :  { %96 = vmatpush.bf16.msra.mxu1 %v174_v3 }
  0x83   :  { %v57_v4 = vpop.f32.mrf.mxu0 }
  0x84   :  { %v58_v6 = vadd.f32 %v181_v5, %v57_v4 }
  0x86   :  { %v62_v9 = vmax.f32 %v58_v6, 0.0 }
  0x8b   :  { %v59_v7 = vpop.f32.mrf.mxu0 }
  0x8c   :  { %v60_v8 = vadd.f32 %v181_v5, %v59_v7 }
  0x8e   :  { %v63_v10 = vmax.f32 %v60_v8, 0.0 }
  0x90   :  { %v64_v11 = vpack.c.bf16 %v63_v10, %v62_v9 }
  0x92   :  { %171 = vmatmul.msk.bf16.vlgmr.msra.gmra.mxu1 %vm85_vm1, %v64_v11 }
 0x10f   :  { %v98_v13 = vpop.f32.mrf.mxu1 }
 0x110   :  { %v99_v14 = vadd.f32 %v182_v12, %v98_v13 }
 0x112   :  { %v105_v15 = vmul.f32 0.5, %v99_v14 }
 0x114   :  { %v107_v16 = vmul.f32 1.442695, %v105_v15 }
 0x116   :  { %183 = vpow2.f32 %v107_v16 }
 0x117   :  { %v100_v17 = vpop.f32.mrf.mxu1 }
 0x118   :  { %v101_v18 = vadd.f32 %v182_v12, %v100_v17 }
 0x11a   :  { %v106_v19 = vmul.f32 0.5, %v101_v18 }
 0x11c   :  { %v184_v20 = vpop.eup %183  ;;  %v109_v21 = vmul.f32 1.442695, %v106_v19 }
 0x11d   :  { %113 = vrot.lane.b32.xlu0 %v184_v20, %s213_s2 }
 0x11e   :  { %185 = vpow2.f32 %v109_v21 }
 0x124   :  { %v186_v22 = vpop.eup %185 }
 0x125   :  { %115 = vrot.lane.b32.xlu0 %v186_v22, %s213_s2 }
 0x18f   :  { %v114_v24 = vpop.permute.xlu0 %113 }
 0x190   :  { %v119_v25 = vmul.f32 %v114_v24, %v103_v23 }
 0x192   :  { %v121_v26 = vadd.f32 %v119_v25, %v99_v14 }
 0x194   :  { %125 = vrot.lane.b32.xlu1 %v121_v26, %s214_s4 }
 0x197   :  { %v116_v28 = vpop.permute.xlu0 %115 }
 0x198   :  { %v120_v29 = vmul.f32 %v116_v28, %v104_v27 }
 0x19a   :  { %v122_v30 = vadd.f32 %v120_v29, %v101_v18 }
 0x19c   :  { %127 = vrot.lane.b32.xlu1 %v122_v30, %s214_s4 }
 0x206   :  { %v126_v31 = vpop.permute.xlu1 %125 }
 0x207   :  { %v131_v32 = vsel %vm44_vm0, %v99_v14, %v126_v31 }
 0x208   :  { %134 = vst.msk [vmem:[#allocation2] sm:$0xff] %vm133_vm2, %v131_v32 }
 0x20e   :  { %v128_v33 = vpop.permute.xlu1 %127 }
 0x20f   :  { %v132_v34 = vsel %vm44_vm0, %v101_v18, %v128_v33 }
 0x210   :  { %135 = vst.msk [vmem:[#allocation2 + $0x8] sm:$0xff] %vm133_vm2, %v132_v34 }
 0x211   :  { %148 = dma.vmem_to_hbm [thread:$0]  %s141_s11, 256, %s143_s14, [#allocation3], %s216_s5, %s216_s5, %s217_s15  }
 0x212   :  { %211 = dma.done.wait [#allocation3], 256  }
 0x213   :  { %212 = vsyncadd [#allocation3], 4294967040 }
 0x214   :  { %153 = vsyncpa [#allocation3], 1 }

</bundles_post_ra>
